<compile_context>
chip_gen: v7x
topology: tpu7x:2x2x1
jax: 0.10.0
libtpu: 0.0.40
codegen_flags: <defaults>
</compile_context>

<pallas_src>
import functools

import jax
import jax.numpy as jnp
from jax.experimental import pallas as pl
from jax.experimental.pallas import tpu as pltpu

IN_CHANNELS = 3
OUT_CHANNELS = 64
KERNEL_SIZES = (3, 5, 7)
KMAX = max(KERNEL_SIZES)          # 7
MAX_PAD = (KMAX - 1) // 2         # 3
MAX_ROW_TILE = 2048               # lane-axis tile cap (pixels per grid step)


def _pick_row_tile(rows, max_tile=MAX_ROW_TILE):
    """Largest multiple-of-128 tile (<= max_tile) giving >=2 (mostly even) grid steps."""
    if rows <= 2 * 128:
        return 128
    target_tiles = max(2, 2 * (-(-rows // (2 * max_tile))))   # even, >= 2
    chunks = -(-rows // 128)
    tile = -(-chunks // target_tiles) * 128
    return min(max(tile, 128), max_tile)


def _msconv_kernel(p_ref, w_ref, o_ref, *, n_branches, cout):
    """One pixel tile per grid step.

    p_ref: (KC_PAD, TR)              bf16  transposed im2col patches (+ ones row for bias)
    w_ref: (n_branches*cout, KC_PAD) bf16  fused transposed conv weights (+ bias column)
    o_ref: (cout, TR)                f32   transposed output tile (lane-dense store)
    """
    # Single MXU matmul for all three branches (bias folded in): (192,KC)@(KC,TR) -> (192,TR)
    acc = jnp.dot(w_ref[...], p_ref[...], preferred_element_type=jnp.float32)
    # Per-branch ReLU then sum; branch split is a sublane slice (no relayout).
    out = jnp.maximum(acc[0:cout], 0.0)
    for g in range(1, n_branches):
        out = out + jnp.maximum(acc[g * cout:(g + 1) * cout], 0.0)
    o_ref[...] = out.astype(o_ref.dtype)


def multi_scale_conv(x_nchw, weights_oihw, biases):
    """Pallas implementation of MultiScaleConvolution.forward (input/output NCHW)."""
    B, Cin, H, W = x_nchw.shape
    Cout = weights_oihw[0].shape[0]
    nb = len(weights_oihw)
    KC = KMAX * KMAX * Cin                          # 147
    KC_PAD = -(-(KC + 1) // 16) * 16                # 160: room for bias row, bf16-tile aligned

    rows = B * H * W
    row_tile = _pick_row_tile(rows)
    n_tiles = pl.cdiv(rows, row_tile)
    rows_pad = n_tiles * row_tile

    # --- glue: bf16, transpose-free im2col (KC-major from the start) ---
    x_cb = jnp.transpose(x_nchw, (1, 0, 2, 3)).astype(jnp.bfloat16)     # (Cin, B, H, W)
    xp = jnp.pad(x_cb, ((0, 0), (0, 0), (MAX_PAD, MAX_PAD), (MAX_PAD, MAX_PAD)))
    taps = [xp[:, :, ky:ky + H, kx:kx + W]
            for ky in range(KMAX) for kx in range(KMAX)]                # each (Cin,B,H,W)
    patches_t = jnp.stack(taps, axis=0).reshape(KC, rows)               # (147, rows), bf16
    patches_t = jnp.pad(patches_t, ((0, 0), (0, rows_pad - rows)))
    patches_t = jnp.concatenate(
        [patches_t,
         jnp.ones((1, rows_pad), jnp.bfloat16),                          # bias row (x = 1)
         jnp.zeros((KC_PAD - KC - 1, rows_pad), jnp.bfloat16)],
        axis=0)                                                          # (160, rows_pad)

    # Fused 7x7 weights: zero-pad 3x3/5x5 spatially, flatten (ky,kx,c), concat Cout; add bias row.
    w_cols = []
    for w, k in zip(weights_oihw, KERNEL_SIZES):
        p = (KMAX - k) // 2
        w7 = jnp.pad(w.astype(jnp.float32), ((0, 0), (0, 0), (p, p), (p, p)))
        w7 = jnp.transpose(w7, (2, 3, 1, 0)).reshape(KC, Cout)           # (tap,c)-major rows
        w_cols.append(w7)
    w_fused = jnp.concatenate(w_cols, axis=1)                            # (147, nb*Cout)
    b_fused = jnp.concatenate([b.reshape(Cout) for b in biases]).astype(jnp.float32)
    w_aug = jnp.concatenate(
        [w_fused, b_fused[None, :],
         jnp.zeros((KC_PAD - KC - 1, nb * Cout), jnp.float32)], axis=0)  # (160, 192)
    w_t = w_aug.T.astype(jnp.bfloat16)                                   # (192, 160), tiny

    kernel = functools.partial(_msconv_kernel, n_branches=nb, cout=Cout)

    out_t = pl.pallas_call(
        kernel,
        out_shape=jax.ShapeDtypeStruct((Cout, rows_pad), jnp.float32),
        grid_spec=pltpu.PrefetchScalarGridSpec(
            num_scalar_prefetch=0,
            grid=(n_tiles,),
            in_specs=[
                pl.BlockSpec((KC_PAD, row_tile), lambda r: (0, r)),
                pl.BlockSpec((nb * Cout, KC_PAD), lambda r: (0, 0)),     # VMEM-resident weights
            ],
            out_specs=pl.BlockSpec((Cout, row_tile), lambda r: (0, r)),
        ),
        compiler_params=pltpu.CompilerParams(
            dimension_semantics=("parallel",),
            vmem_limit_bytes=32 * 1024 * 1024,
        ),
    )(patches_t, w_t)

    out = out_t[:, :rows].reshape(Cout, B, H, W)
    return jnp.transpose(out, (1, 0, 2, 3))      # back to NCHW, like PyTorch


def _reference(x_nchw, weights_oihw, biases):
    """Pure-JAX (f32) reference matching the PyTorch forward."""
    out = None
    for w, b, k in zip(weights_oihw, biases, KERNEL_SIZES):
        p = (k - 1) // 2
        y = jax.lax.conv_general_dilated(
            x_nchw, w, window_strides=(1, 1),
            padding=[(p, p), (p, p)],
            dimension_numbers=("NCHW", "OIHW", "NCHW"))
        y = jnp.maximum(y + b.reshape(1, -1, 1, 1), 0.0)
        out = y if out is None else out + y
    return out


def _init_params(key, in_channels, out_channels):
    """Deterministic PyTorch-like (uniform fan-in) init for the three convs."""
    weights, biases = [], []
    for k in KERNEL_SIZES:
        key, kw, kb = jax.random.split(key, 3)
        bound = 1.0 / jnp.sqrt(in_channels * k * k)
        w = jax.random.uniform(kw, (out_channels, in_channels, k, k),
                               jnp.float32, -bound, bound)
        b = jax.random.uniform(kb, (out_channels,), jnp.float32, -bound, bound)
        weights.append(w)
        biases.append(b)
    return weights, biases


if __name__ == "__main__":
    key = jax.random.PRNGKey(0)
    key, kx = jax.random.split(key)
    B, H, W = 2, 16, 16
    x = jax.random.normal(kx, (B, IN_CHANNELS, H, W), jnp.float32)

    weights, biases = _init_params(key, IN_CHANNELS, OUT_CHANNELS)

    out = jax.block_until_ready(multi_scale_conv(x, weights, biases))

    ref = _reference(x, weights, biases)
    assert out.shape == (B, OUT_CHANNELS, H, W)
    max_err = jnp.max(jnp.abs(out - ref))
    assert jnp.allclose(out, ref, rtol=5e-2, atol=5e-2), (
        f"mismatch vs JAX reference (max abs err {max_err})")  # bf16 inputs, f32 accumulation

    print("KERNEL_OK")
</pallas_src>

<mosaic_0001>
module attributes {stable_mosaic.version = 11 : i64} {
  func.func @_msconv_kernel(%arg0: i32, %arg1: memref<160x256xbf16, #tpu.memory_space<vmem>>, %arg2: memref<192x160xbf16, #tpu.memory_space<vmem>>, %arg3: memref<64x256xf32, #tpu.memory_space<vmem>>) attributes {dimension_semantics = [#tpu.dimension_semantics<parallel>], iteration_bounds = array<i64: 2>, scalar_prefetch = 0 : i64, scratch_operands = 0 : i64, tpu.core_type = #tpu.core_type<tc>, window_params = [{transform_indices = @transform_0, window_bounds = array<i64: 160, 256>}, {pipeline_mode = #tpu.pipeline_mode<synchronous>, transform_indices = @transform_1, window_bounds = array<i64: 192, 160>}, {transform_indices = @transform_2, window_bounds = array<i64: 64, 256>}]} {
    %c0 = arith.constant 0 : index
    %c0_0 = arith.constant 0 : index
    %0 = vector.load %arg2[%c0, %c0_0] : memref<192x160xbf16, #tpu.memory_space<vmem>>, vector<192x160xbf16>
    %c0_1 = arith.constant 0 : index
    %c0_2 = arith.constant 0 : index
    %1 = vector.load %arg1[%c0_1, %c0_2] : memref<160x256xbf16, #tpu.memory_space<vmem>>, vector<160x256xbf16>
    %cst = arith.constant dense<0.000000e+00> : vector<192x256xf32>
    %2 = tpu.matmul %0, %1, %cst {dimension_numbers = #tpu.dot_dimension_numbers<[1], [0], [0], [1], [0, 0, 1, 1], [], []>} : vector<192x160xbf16>, vector<160x256xbf16>, vector<192x256xf32> -> vector<192x256xf32>
    %3 = vector.extract_strided_slice %2 {offsets = [0, 0], sizes = [64, 256], strides = [1, 1]} : vector<192x256xf32> to vector<64x256xf32>
    %cst_3 = arith.constant 0.000000e+00 : f32
    %4 = vector.broadcast %cst_3 : f32 to vector<64x256xf32>
    %5 = arith.maximumf %3, %4 : vector<64x256xf32>
    %6 = vector.extract_strided_slice %2 {offsets = [64, 0], sizes = [64, 256], strides = [1, 1]} : vector<192x256xf32> to vector<64x256xf32>
    %cst_4 = arith.constant 0.000000e+00 : f32
    %7 = vector.broadcast %cst_4 : f32 to vector<64x256xf32>
    %8 = arith.maximumf %6, %7 : vector<64x256xf32>
    %9 = arith.addf %5, %8 : vector<64x256xf32>
    %10 = vector.extract_strided_slice %2 {offsets = [128, 0], sizes = [64, 256], strides = [1, 1]} : vector<192x256xf32> to vector<64x256xf32>
    %cst_5 = arith.constant 0.000000e+00 : f32
    %11 = vector.broadcast %cst_5 : f32 to vector<64x256xf32>
    %12 = arith.maximumf %10, %11 : vector<64x256xf32>
    %13 = arith.addf %9, %12 : vector<64x256xf32>
    %c0_6 = arith.constant 0 : index
    %c0_7 = arith.constant 0 : index
    %14 = vector.load %arg3[%c0_6, %c0_7] : memref<64x256xf32, #tpu.memory_space<vmem>>, vector<64x256xf32>
    tpu.vector_store %arg3[%c0_6, %c0_7], %13 {strides = array<i32>} : memref<64x256xf32, #tpu.memory_space<vmem>>, vector<64x256xf32>,
    return
  }
  func.func @transform_0(%arg0: i32) -> (i32, i32) {
    %c0_i32 = arith.constant 0 : i32
    %c0_i32_0 = arith.constant 0 : i32
    return %c0_i32, %arg0 : i32, i32
  }
  func.func @transform_1(%arg0: i32) -> (i32, i32) {
    %c0_i32 = arith.constant 0 : i32
    %c0_i32_0 = arith.constant 0 : i32
    %c0_i32_1 = arith.constant 0 : i32
    return %c0_i32, %c0_i32_0 : i32, i32
  }
  func.func @transform_2(%arg0: i32) -> (i32, i32) {
    %c0_i32 = arith.constant 0 : i32
    %c0_i32_0 = arith.constant 0 : i32
    return %c0_i32, %arg0 : i32, i32
  }
}

</mosaic_0001>

<bundles_post_ra>
// kernel: tpu_custom_call.1
= control target key start
LH: loop header
LB: loop body
LE: loop exit
PB: predicated region body
PF: predicated region fallthrough
CT: control target
= control target key end

     0   :  { %7 = vsyncpa [#allocation4], 0  ;;  %s1500_s0 = inlined_call_operand.vmem [shape: bf16[160,512], index: 0, kind: input, shape index: {}]   ;;  %s1501_s1 = inlined_call_operand.vmem [shape: bf16[192,160], index: 1, kind: input, shape index: {}]   ;;  %s1502_s2 = inlined_call_operand.hbm [shape: f32[64,512], index: 2, kind: output, shape index: {}]  }
   0x1   :  { %9 = vsyncpa [#allocation4 + $0x1], 0  ;;  %s1159_s9 = smov 0   ;;  %s1161_s10 = smov 0  }
   0x2   :  { %s1163_s11 = smov 0   ;;  %s1165_s12 = smov 0  }
   0x3 LB: > { %s875_s13 = sadd.s32 4294967295, %s1138_s12   ;;  %s876_s14 = sadd.s32 4294967294, %s1138_s12   ;;  %s1138_s12 = sphi %s1165_s12, %s1508_s12   ;;  %s1134_s11 = sphi %s1163_s11, %s1507_s11   ;;  %s1130_s10 = sphi %s1161_s10, %s1506_s10   ;;  %s1126_s9 = sphi %s1159_s9, %s1505_s9  }
   0x4   : > { %s1182_s15 = sadd.s32 1, %s1138_s12   ;;  %s22_s16 = sadd.s32 1, %s1134_s11 }
   0x5   : > { %s19_s17 = ssub.s32 %s1138_s12, %s1182_s15  ;;  %p29_p0 = scmp.ne.s32.totalorder %s1134_s11, %s1130_s10 }
   0x6   : > { %p20_p1 = scmp.eq.s32.totalorder %s19_s17, 0  ;;  %p30_p2 = scmp.eq.s32.totalorder %s1138_s12, 0 }
   0x7   : > { %p80_p3 = scmp.eq.s32.totalorder %s875_s13, 1  ;;  %p85_p4 = scmp.ne.s32.totalorder %s1130_s10, %s1126_s9 }
   0x8   : > { %s1195_s18 = scalar_select %p20_p1, %s1134_s11, %s22_s16  }
   0x9   : > { %p31_p5 = por %p30_p2, %p29_p0  ;;  %p1197_p6 = por %p80_p3, %p29_p0 }
   0xa   : > { %p86_p7 = scmp.eq.s32.totalorder %s876_s14, 1  ;;  %p878_p9 = scmp.ge.s32.totalorder %s1138_s12, 2 }
   0xc   : > { %p1201_p8 = por %p86_p7, %p85_p4  ;;  %105 = sbr.rel (%p878_p9) target bundleno = 33 (0x21), region = 20 }
  0x13   : > { %108 = sbr.rel (!%p31_p5) target bundleno = 33 (0x21), region = 24  ;;  %s110_s21 = sand.u32 (%p31_p5), 1, %s1134_s11  }
  0x14   : > { %s944_s22 = sshll.u32 (%p31_p5), %s1138_s12, 3  ;;  %s966_s23 = smul.u32 (%p31_p5), 160, %s110_s21 }
  0x15   : > { %s1213_s26 = scalar_lea.vmem (%p31_p5), %s1500_s0, %s944_s22 }
  0x16   : > { %v181_v0 = vld [vmem:[%s1213_s26] sm:$0xff] (%p31_p5)  ;;  %v183_v1 = vld [vmem:[%s1213_s26 + $0x10] sm:$0xff] (%p31_p5)  ;;  %s1221_s27 = scalar_lea.vmem (%p31_p5), [#allocation2], %s966_s23 }
  0x17   : > { %v185_v2 = vld [vmem:[%s1213_s26 + $0x20] sm:$0xff] (%p31_p5)  ;;  %v187_v3 = vld [vmem:[%s1213_s26 + $0x30] sm:$0xff] (%p31_p5)  ;;  %182 = vst [vmem:[%s1221_s27] sm:$0xff] (%p31_p5), %v181_v0  ;;  %184 = vst [vmem:[%s1221_s27 + $0x8] sm:$0xff] (%p31_p5), %v183_v1 }
  0x18   : > { %v189_v4 = vld [vmem:[%s1213_s26 + $0x40] sm:$0xff] (%p31_p5)  ;;  %v191_v5 = vld [vmem:[%s1213_s26 + $0x50] sm:$0xff] (%p31_p5)  ;;  %186 = vst [vmem:[%s1221_s27 + $0x10] sm:$0xff] (%p31_p5), %v185_v2  ;;  %188 = vst [vmem:[%s1221_s27 + $0x18] sm:$0xff] (%p31_p5), %v187_v3 }
  0x19   : > { %190 = vst [vmem:[%s1221_s27 + $0x20] sm:$0xff] (%p31_p5), %v189_v4  ;;  %192 = vst [vmem:[%s1221_s27 + $0x28] sm:$0xff] (%p31_p5), %v191_v5  ;;  %v193_v6 = vld [vmem:[%s1213_s26 + $0x60] sm:$0xff] (%p31_p5)  ;;  %v195_v7 = vld [vmem:[%s1213_s26 + $0x70] sm:$0xff] (%p31_p5) }
  0x1a   : > { %v197_v8 = vld [vmem:[%s1213_s26 + $0x80] sm:$0xff]  ;;  %194 = vst [vmem:[%s1221_s27 + $0x30] sm:$0xff] %v193_v6  ;;  %196 = vst [vmem:[%s1221_s27 + $0x38] sm:$0xff] %v195_v7  ;;  %v199_v9 = vld [vmem:[%s1213_s26 + $0x90] sm:$0xff] }
  0x1b   : > { %198 = vst [vmem:[%s1221_s27 + $0x40] sm:$0xff] %v197_v8  ;;  %v201_v10 = vld [vmem:[%s1213_s26 + $0xa0] sm:$0xff]  ;;  %v203_v11 = vld [vmem:[%s1213_s26 + $0xb0] sm:$0xff]  ;;  %200 = vst [vmem:[%s1221_s27 + $0x48] sm:$0xff] %v199_v9 }
  0x1c   : > { %202 = vst [vmem:[%s1221_s27 + $0x50] sm:$0xff] %v201_v10  ;;  %204 = vst [vmem:[%s1221_s27 + $0x58] sm:$0xff] %v203_v11  ;;  %v205_v12 = vld [vmem:[%s1213_s26 + $0xc0] sm:$0xff]  ;;  %v207_v13 = vld [vmem:[%s1213_s26 + $0xd0] sm:$0xff] }
  0x1d   : > { %v209_v14 = vld [vmem:[%s1213_s26 + $0xe0] sm:$0xff]  ;;  %206 = vst [vmem:[%s1221_s27 + $0x60] sm:$0xff] %v205_v12  ;;  %208 = vst [vmem:[%s1221_s27 + $0x68] sm:$0xff] %v207_v13  ;;  %v211_v15 = vld [vmem:[%s1213_s26 + $0xf0] sm:$0xff] }
  0x1e   : > { %210 = vst [vmem:[%s1221_s27 + $0x70] sm:$0xff] %v209_v14  ;;  %v213_v16 = vld [vmem:[%s1213_s26 + $0x100] sm:$0xff]  ;;  %v215_v17 = vld [vmem:[%s1213_s26 + $0x110] sm:$0xff]  ;;  %212 = vst [vmem:[%s1221_s27 + $0x78] sm:$0xff] %v211_v15 }
  0x1f   : > { %214 = vst [vmem:[%s1221_s27 + $0x80] sm:$0xff] %v213_v16  ;;  %216 = vst [vmem:[%s1221_s27 + $0x88] sm:$0xff] %v215_v17  ;;  %v217_v18 = vld [vmem:[%s1213_s26 + $0x120] sm:$0xff]  ;;  %v219_v19 = vld [vmem:[%s1213_s26 + $0x130] sm:$0xff] }
  0x20   : > { %218 = vst [vmem:[%s1221_s27 + $0x90] sm:$0xff] %v217_v18  ;;  %220 = vst [vmem:[%s1221_s27 + $0x98] sm:$0xff] %v219_v19 }
  0x21 PF: > { %p881_p10 = scmp.ge.s32.totalorder %s1138_s12, 1  ;;  %p225_p11 = scmp.lt.s32.totalorder %s1138_s12, 3 }
  0x23   : > { %p226_p12 = pnand %p881_p10, %p225_p11 }
  0x24   : > { %s1260_s28 = sand.u32 (!%p226_p12), 1, %s1130_s10   ;;  %vm508_vm0 = vcmask (!%p226_p12), 261120   ;;  %v1042_v20 = vld [vmem:[%s1501_s1 + $0x4] ss:$8 sps:$4 sm:$0xff] (!%p226_p12)   ;;  %v1040_v42 = vld [vmem:[%s1501_s1] ss:$8 sps:$4 sm:$0xff] (!%p226_p12)  }
  0x25   : > { %229 = sbr.rel (%p226_p12) target bundleno = 359 (0x167), region = 62  ;;  %v1045_v21 = vld [vmem:[%s1501_s1 + $0x64] ss:$8 sps:$4 sm:$0xff] (!%p226_p12)   ;;  %927 = vmatprep.mubr.msk.bf16.mxu0 (!%p226_p12), %vm508_vm0, %v1042_v20  ;;  %v1043_v43 = vld [vmem:[%s1501_s1 + $0x60] ss:$8 sps:$4 sm:$0xff] (!%p226_p12)   ;;  %s882_s24 = sshll.u32 (!%p226_p12), %s1260_s28, 7 }
  0x26   : > { %s967_s29 = smul.u32 (!%p226_p12), 160, %s1260_s28  ;;  %933 = vmatprep.mubr.msk.bf16.mxu1 (!%p226_p12), %vm508_vm0, %v1045_v21  ;;  %v1046_v44 = vld [vmem:[%s1501_s1 + $0x14] ss:$8 sps:$4 sm:$0xff] (!%p226_p12)   ;;  %v1050_v46 = vld [vmem:[%s1501_s1 + $0x10] ss:$8 sps:$4 sm:$0xff] (!%p226_p12)   ;;  %s1417_s25 = scalar_lea.vmem (!%p226_p12), [#allocation3], %s882_s24 }
  0x27   : > { %v1048_v45 = vld [vmem:[%s1501_s1 + $0x74] ss:$8 sps:$4 sm:$0xff] (!%p226_p12)   ;;  %v1051_v47 = vld [vmem:[%s1501_s1 + $0x70] ss:$8 sps:$4 sm:$0xff] (!%p226_p12)   ;;  %v1052_v48 = vld [vmem:[%s1501_s1 + $0x24] ss:$8 sps:$4 sm:$0xff] (!%p226_p12)  }
  0x28   : > { %s1270_s6 = scalar_lea.vmem (!%p226_p12), [#allocation2], %s967_s29  ;;  %v1054_v49 = vld [vmem:[%s1501_s1 + $0x84] ss:$8 sps:$4 sm:$0xff] (!%p226_p12)   ;;  %v1056_v50 = vld [vmem:[%s1501_s1 + $0x20] ss:$8 sps:$4 sm:$0xff] (!%p226_p12)   ;;  %s945_s26 = sshll.u32 (!%p226_p12), %s875_s13, 8 }
  0x29   : > { %v1010_v22 = vld [vmem:[%s1270_s6 + $0x4] ss:$8 sps:$4 sm:$0xff] (!%p226_p12)   ;;  %v1012_v23 = vld [vmem:[%s1270_s6] ss:$8 sps:$4 sm:$0xff] (!%p226_p12)   ;;  %v1013_v24 = vld [vmem:[%s1270_s6 + $0x14] ss:$8 sps:$4 sm:$0xff] (!%p226_p12)   ;;  %s1448_s30 = scalar_lea.hbm (!%p226_p12), %s1502_s2, %s945_s26 }
  0x2a   : > { %545 = vmatprep.subr.bf16.mxu0 (!%p226_p12), %v1010_v22  ;;  %946 = vmatprep.subr.bf16.mxu1 (!%p226_p12), %v1010_v22  ;;  %v1015_v25 = vld [vmem:[%s1270_s6 + $0x10] ss:$8 sps:$4 sm:$0xff] (!%p226_p12)   ;;  %v1016_v26 = vld [vmem:[%s1270_s6 + $0x24] ss:$8 sps:$4 sm:$0xff] (!%p226_p12)   ;;  %v1018_v27 = vld [vmem:[%s1270_s6 + $0x20] ss:$8 sps:$4 sm:$0xff] (!%p226_p12)  }
  0x2b   : > { %546 = vmatpush1.bf16.msra.mxu0 (!%p226_p12), %v1012_v23  ;;  %956 = vmatpush1.bf16.msra.mxu1 (!%p226_p12), %v1012_v23  ;;  %v1019_v28 = vld [vmem:[%s1270_s6 + $0x34] ss:$8 sps:$4 sm:$0xff] (!%p226_p12)   ;;  %v1021_v29 = vld [vmem:[%s1270_s6 + $0x30] ss:$8 sps:$4 sm:$0xff] (!%p226_p12)   ;;  %v1022_v30 = vld [vmem:[%s1270_s6 + $0x44] ss:$8 sps:$4 sm:$0xff] (!%p226_p12)  }
  0x2c   : > { %547 = vmatprep.subr.bf16.mxu0 %v1013_v24  ;;  %947 = vmatprep.subr.bf16.mxu1 %v1013_v24  ;;  %v1024_v31 = vld [vmem:[%s1270_s6 + $0x40] ss:$8 sps:$4 sm:$0xff]   ;;  %v1025_v32 = vld [vmem:[%s1270_s6 + $0x54] ss:$8 sps:$4 sm:$0xff]   ;;  %v1027_v33 = vld [vmem:[%s1270_s6 + $0x50] ss:$8 sps:$4 sm:$0xff]  }
  0x2d   : > { %v1028_v34 = vld [vmem:[%s1270_s6 + $0x64] ss:$8 sps:$4 sm:$0xff]   ;;  %v1030_v35 = vld [vmem:[%s1270_s6 + $0x60] ss:$8 sps:$4 sm:$0xff]   ;;  %v1031_v36 = vld [vmem:[%s1270_s6 + $0x74] ss:$8 sps:$4 sm:$0xff]  }
  0x2e   : > { %v1033_v37 = vld [vmem:[%s1270_s6 + $0x70] ss:$8 sps:$4 sm:$0xff]   ;;  %v1034_v38 = vld [vmem:[%s1270_s6 + $0x84] ss:$8 sps:$4 sm:$0xff]   ;;  %v1036_v39 = vld [vmem:[%s1270_s6 + $0x80] ss:$8 sps:$4 sm:$0xff]  }
  0x2f   : > { %548 = vmatpush1.bf16.msra.mxu0 %v1015_v25  ;;  %957 = vmatpush1.bf16.msra.mxu1 %v1015_v25  ;;  %v1037_v40 = vld [vmem:[%s1270_s6 + $0x94] ss:$8 sps:$4 sm:$0xff]   ;;  %v1039_v41 = vld [vmem:[%s1270_s6 + $0x90] ss:$8 sps:$4 sm:$0xff]   ;;  %v1057_v51 = vld [vmem:[%s1501_s1 + $0x80] ss:$8 sps:$4 sm:$0xff]  }
  0x30   : > { %549 = vmatprep.subr.bf16.mxu0 %v1016_v26  ;;  %948 = vmatprep.subr.bf16.mxu1 %v1016_v26  ;;  %v1058_v52 = vld [vmem:[%s1501_s1 + $0x34] ss:$8 sps:$4 sm:$0xff]   ;;  %v1062_v54 = vld [vmem:[%s1501_s1 + $0x30] ss:$8 sps:$4 sm:$0xff]   ;;  %v1064_v56 = vld [vmem:[%s1501_s1 + $0x44] ss:$8 sps:$4 sm:$0xff]  }
  0x31   : > { %v1060_v53 = vld [vmem:[%s1501_s1 + $0x94] ss:$8 sps:$4 sm:$0xff]   ;;  %v1063_v55 = vld [vmem:[%s1501_s1 + $0x90] ss:$8 sps:$4 sm:$0xff]   ;;  %v1066_v57 = vld [vmem:[%s1501_s1 + $0xa4] ss:$8 sps:$4 sm:$0xff]  }
  0x32   : > { %v1068_v58 = vld [vmem:[%s1501_s1 + $0x40] ss:$8 sps:$4 sm:$0xff]   ;;  %v1070_v60 = vld [vmem:[%s1501_s1 + $0x54] ss:$8 sps:$4 sm:$0xff]   ;;  %v1074_v62 = vld [vmem:[%s1501_s1 + $0x50] ss:$8 sps:$4 sm:$0xff]  }
  0x33   : > { %550 = vmatpush1.bf16.msra.mxu0 %v1018_v27  ;;  %958 = vmatpush1.bf16.msra.mxu1 %v1018_v27  ;;  %v1069_v59 = vld [vmem:[%s1501_s1 + $0xa0] ss:$8 sps:$4 sm:$0xff]   ;;  %v1072_v61 = vld [vmem:[%s1501_s1 + $0xb4] ss:$8 sps:$4 sm:$0xff]   ;;  %v1075_v63 = vld [vmem:[%s1501_s1 + $0xb0] ss:$8 sps:$4 sm:$0xff]  }
  0x34   : > { %551 = vmatprep.subr.bf16.mxu0 %v1019_v28  ;;  %949 = vmatprep.subr.bf16.mxu1 %v1019_v28  ;;  %s808_s27 = sshll.u32 %s1417_s25, 4  ;;  %s795_s3 = scalar_lea.sflag [#allocation4], %s1260_s28  ;;  %s1452_s27 = int_to_ptr.vmem [resolvable:$true] %s808_s27 }
  0x35   : > { %s1076_s4 = scalar_lea.vmem %s1452_s27, 2048  ;;  %s1140_s5 = smov [#allocation3]  }
  0x36   : > { %p1077_p13 = scmp.ne.s32.totalorder %s1452_s27, %s1076_s4  ;;  %s1080_s6 = sshll.u32 %s1140_s5, 4  ;;  %s1081_s6 = int_to_ptr.vmem [resolvable:$false] %s1080_s6 }
  0x37   : > { %552 = vmatpush1.bf16.msra.mxu0 %v1021_v29  ;;  %959 = vmatpush1.bf16.msra.mxu1 %v1021_v29  ;;  %s1082_s7 = scalar_lea.vmem %s1081_s6, 4096  ;;  %p1083_p2 = scmp.lt.s32.totalorder %s1452_s27, %s1081_s6 }
  0x38   : > { %553 = vmatprep.subr.bf16.mxu0 %v1022_v30  ;;  %950 = vmatprep.subr.bf16.mxu1 %v1022_v30  ;;  %p1078_p0 = pnand %p1077_p13, %p1197_p6  ;;  %p1084_p3 = scmp.lt.s32.totalorder %s1082_s7, %s1076_s4 }
  0x3a   : > { %p1079_p1 = pneg %p1078_p0  ;;  %p1085_p4 = por %p1084_p3, %p1083_p2 }
  0x3b   : > { %554 = vmatpush1.bf16.msra.mxu0 %v1024_v31  ;;  %960 = vmatpush1.bf16.msra.mxu1 %v1024_v31 }
  0x3c   : > { %555 = vmatprep.subr.bf16.mxu0 %v1025_v32  ;;  %951 = vmatprep.subr.bf16.mxu1 %v1025_v32  ;;  %p1086_p5 = pnand %p1085_p4, %p1079_p1 }
  0x3f   : > { %556 = vmatpush1.bf16.msra.mxu0 %v1027_v33  ;;  %961 = vmatpush1.bf16.msra.mxu1 %v1027_v33 }
  0x40   : > { %557 = vmatprep.subr.bf16.mxu0 %v1028_v34  ;;  %952 = vmatprep.subr.bf16.mxu1 %v1028_v34 }
  0x43   : > { %558 = vmatpush1.bf16.msra.mxu0 %v1030_v35  ;;  %962 = vmatpush1.bf16.msra.mxu1 %v1030_v35 }
  0x44   : > { %559 = vmatprep.subr.bf16.mxu0 %v1031_v36  ;;  %953 = vmatprep.subr.bf16.mxu1 %v1031_v36 }
  0x47   : > { %560 = vmatpush1.bf16.msra.mxu0 %v1033_v37  ;;  %963 = vmatpush1.bf16.msra.mxu1 %v1033_v37 }
  0x48   : > { %561 = vmatprep.subr.bf16.mxu0 %v1034_v38  ;;  %954 = vmatprep.subr.bf16.mxu1 %v1034_v38 }
  0x4b   : > { %562 = vmatpush1.bf16.msra.mxu0 %v1036_v39  ;;  %964 = vmatpush1.bf16.msra.mxu1 %v1036_v39 }
  0x4c   : > { %563 = vmatprep.subr.bf16.mxu0 %v1037_v40  ;;  %955 = vmatprep.subr.bf16.mxu1 %v1037_v40 }
  0x4f   : > { %564 = vmatpush1.bf16.msra.mxu0 %v1039_v41  ;;  %965 = vmatpush1.bf16.msra.mxu1 %v1039_v41 }
  0x52   : > { %578 = vmatmul.mubr.bf16.vlgmr.msra.gmra.mrb[0].mxu0 %v1040_v42  ;;  %638 = vmatmul.mubr.bf16.vlgmr.msra.gmra.mrb[0].mxu1 %v1043_v43 }
  0x53   : > { %928 = vmatprep.mubr.msk.bf16.mxu0 %vm508_vm0, %v1046_v44  ;;  %934 = vmatprep.mubr.msk.bf16.mxu1 %vm508_vm0, %v1048_v45 }
  0x5a   : > { %588 = vmatmul.mubr.bf16.gmra.mrb[4].mxu0 %v1050_v46  ;;  %648 = vmatmul.mubr.bf16.gmra.mrb[4].mxu1 %v1051_v47 }
  0x5b   : > { %929 = vmatprep.mubr.msk.bf16.mxu0 %vm508_vm0, %v1052_v48  ;;  %935 = vmatprep.mubr.msk.bf16.mxu1 %vm508_vm0, %v1054_v49 }
  0x62   : > { %598 = vmatmul.mubr.bf16.gmra.mrb[8].mxu0 %v1056_v50  ;;  %658 = vmatmul.mubr.bf16.gmra.mrb[8].mxu1 %v1057_v51 }
  0x63   : > { %930 = vmatprep.mubr.msk.bf16.mxu0 %vm508_vm0, %v1058_v52  ;;  %936 = vmatprep.mubr.msk.bf16.mxu1 %vm508_vm0, %v1060_v53 }
  0x6a   : > { %608 = vmatmul.mubr.bf16.gmra.mrb[12].mxu0 %v1062_v54  ;;  %668 = vmatmul.mubr.bf16.gmra.mrb[12].mxu1 %v1063_v55 }
  0x6b   : > { %931 = vmatprep.mubr.msk.bf16.mxu0 %vm508_vm0, %v1064_v56  ;;  %937 = vmatprep.mubr.msk.bf16.mxu1 %vm508_vm0, %v1066_v57 }
  0x72   : > { %618 = vmatmul.mubr.bf16.gmra.mrb[16].mxu0 %v1068_v58  ;;  %678 = vmatmul.mubr.bf16.gmra.mrb[16].mxu1 %v1069_v59 }
  0x73   : > { %932 = vmatprep.mubr.msk.bf16.mxu0 %vm508_vm0, %v1070_v60  ;;  %938 = vmatprep.mubr.msk.bf16.mxu1 %vm508_vm0, %v1072_v61 }
  0x7a   : > { %628 = vmatmul.mubr.bf16.gmra.mrb[20].mxu0 %v1074_v62  ;;  %688 = vmatmul.mubr.bf16.gmra.mrb[20].mxu1 %v1075_v63 }
 0x125   : > { %v1369_v0 = vpop.f32.mrb[0].mxu0  ;;  %v639_v1 = vpop.f32.mrb[0].mxu1 }
 0x126   : > { %v1371_v2 = vpop.f32.mrb[1].mxu0  ;;  %v641_v3 = vpop.f32.mrb[1].mxu1  ;;  %v722_v18 = vmax.f32 %v639_v1, 0.0  ;;  %v698_v56 = vmax.f32 %v1369_v0, 0.0 }
 0x127   : > { %v1373_v4 = vpop.f32.mrb[2].mxu0  ;;  %v643_v5 = vpop.f32.mrb[2].mxu1  ;;  %v723_v22 = vmax.f32 %v641_v3, 0.0  ;;  %v699_v57 = vmax.f32 %v1371_v2, 0.0 }
 0x128   : > { %v1375_v6 = vpop.f32.mrb[3].mxu0  ;;  %v645_v7 = vpop.f32.mrb[3].mxu1  ;;  %v724_v26 = vmax.f32 %v643_v5, 0.0  ;;  %v700_v60 = vmax.f32 %v1373_v4, 0.0 }
 0x129   : > { %v725_v31 = vmax.f32 %v645_v7, 0.0  ;;  %v701_v61 = vmax.f32 %v1375_v6, 0.0 }
 0x12d   : > { %v1377_v8 = vpop.f32.mrb[4].mxu0  ;;  %v649_v9 = vpop.f32.mrb[4].mxu1 }
 0x12e   : > { %v1379_v10 = vpop.f32.mrb[5].mxu0  ;;  %v651_v11 = vpop.f32.mrb[5].mxu1  ;;  %v726_v38 = vmax.f32 %v649_v9, 0.0 }
 0x12f   : > { %v1381_v12 = vpop.f32.mrb[6].mxu0  ;;  %v653_v13 = vpop.f32.mrb[6].mxu1  ;;  %v727_v42 = vmax.f32 %v651_v11, 0.0 }
 0x130   : > { %v1383_v14 = vpop.f32.mrb[7].mxu0  ;;  %v655_v15 = vpop.f32.mrb[7].mxu1  ;;  %v728_v46 = vmax.f32 %v653_v13, 0.0 }
 0x131   : > { %v729_v51 = vmax.f32 %v655_v15, 0.0 }
 0x135   : > { %v599_v16 = vpop.f32.mrb[8].mxu0  ;;  %v1385_v17 = vpop.f32.mrb[8].mxu1 }
 0x136   : > { %v706_v19 = vmax.f32 %v599_v16, 0.0  ;;  %v601_v20 = vpop.f32.mrb[9].mxu0  ;;  %v1387_v21 = vpop.f32.mrb[9].mxu1  ;;  %v746_v5 = vmax.f32 %v1385_v17, 0.0 }
 0x137   : > { %v707_v23 = vmax.f32 %v601_v20, 0.0  ;;  %v603_v24 = vpop.f32.mrb[10].mxu0  ;;  %v1389_v25 = vpop.f32.mrb[10].mxu1  ;;  %v747_v7 = vmax.f32 %v1387_v21, 0.0 }
 0x138   : > { %v738_v27 = vadd.f32 %v722_v18, %v706_v19  ;;  %v708_v28 = vmax.f32 %v603_v24, 0.0  ;;  %v605_v29 = vpop.f32.mrb[11].mxu0  ;;  %v1391_v30 = vpop.f32.mrb[11].mxu1  ;;  %v748_v24 = vmax.f32 %v1389_v25, 0.0 }
 0x139   : > { %v739_v32 = vadd.f32 %v723_v22, %v707_v23  ;;  %v709_v33 = vmax.f32 %v605_v29, 0.0 }
 0x13a   : > { %v740_v34 = vadd.f32 %v724_v26, %v708_v28 }
 0x13b   : > { %v741_v35 = vadd.f32 %v725_v31, %v709_v33  ;;  %v703_v33 = vmax.f32 %v1379_v10, 0.0 }
 0x13d   : > { %v609_v36 = vpop.f32.mrb[12].mxu0  ;;  %v1393_v37 = vpop.f32.mrb[12].mxu1 }
 0x13e   : > { %v710_v39 = vmax.f32 %v609_v36, 0.0  ;;  %v611_v40 = vpop.f32.mrb[13].mxu0  ;;  %v1395_v41 = vpop.f32.mrb[13].mxu1 }
 0x13f   : > { %v711_v43 = vmax.f32 %v611_v40, 0.0  ;;  %v613_v44 = vpop.f32.mrb[14].mxu0  ;;  %v1397_v45 = vpop.f32.mrb[14].mxu1 }
 0x140   : > { %v1399_v47 = vadd.f32 %v726_v38, %v710_v39  ;;  %v712_v48 = vmax.f32 %v613_v44, 0.0  ;;  %v615_v49 = vpop.f32.mrb[15].mxu0  ;;  %v1401_v50 = vpop.f32.mrb[15].mxu1  ;;  %v705_v39 = vmax.f32 %v1383_v14, 0.0  ;;  %v751_v44 = vmax.f32 %v1395_v41, 0.0 }
 0x141   : > { %v1403_v52 = vadd.f32 %v727_v42, %v711_v43  ;;  %v713_v53 = vmax.f32 %v615_v49, 0.0 }
 0x142   : > { %v1405_v54 = vadd.f32 %v728_v46, %v712_v48 }
 0x143   : > { %v1408_v55 = vadd.f32 %v729_v51, %v713_v53 }
 0x145   : > { %v619_v58 = vpop.f32.mrb[16].mxu0  ;;  %v679_v59 = vpop.f32.mrb[16].mxu1 }
 0x146   : > { %v714_v62 = vmax.f32 %v619_v58, 0.0  ;;  %v754_v63 = vmax.f32 %v679_v59, 0.0  ;;  %v621_v1 = vpop.f32.mrb[17].mxu0  ;;  %v681_v3 = vpop.f32.mrb[17].mxu1 }
 0x147   : > { %v715_v9 = vmax.f32 %v621_v1, 0.0  ;;  %v755_v11 = vmax.f32 %v681_v3, 0.0  ;;  %v623_v13 = vpop.f32.mrb[18].mxu0  ;;  %v683_v0 = vpop.f32.mrb[18].mxu1 }
 0x148   : > { %v730_v15 = vadd.f32 %v714_v62, %v698_v56  ;;  %v770_v2 = vadd.f32 %v754_v63, %v738_v27  ;;  %v716_v16 = vmax.f32 %v623_v13, 0.0  ;;  %v756_v18 = vmax.f32 %v683_v0, 0.0  ;;  %v625_v19 = vpop.f32.mrb[19].mxu0  ;;  %v685_v4 = vpop.f32.mrb[19].mxu1 }
 0x149   : > { %v731_v20 = vadd.f32 %v715_v9, %v699_v57  ;;  %v771_v6 = vadd.f32 %v755_v11, %v739_v32  ;;  %v717_v22 = vmax.f32 %v625_v19, 0.0  ;;  %v757_v23 = vmax.f32 %v685_v4, 0.0 }
 0x14a   : > { %v762_v26 = vadd.f32 %v746_v5, %v730_v15  ;;  %786 = vst [vmem:[%s1417_s25 + $0x40] sm:$0xff] %v770_v2  ;;  %v732_v17 = vadd.f32 %v716_v16, %v700_v60  ;;  %v772_v21 = vadd.f32 %v756_v18, %v740_v34  ;;  %v749_v27 = vmax.f32 %v1391_v30, 0.0 }
 0x14b   : > { %v763_v28 = vadd.f32 %v747_v7, %v731_v20  ;;  %787 = vst [vmem:[%s1417_s25 + $0x48] sm:$0xff] %v771_v6  ;;  %v733_v29 = vadd.f32 %v717_v22, %v701_v61  ;;  %v773_v31 = vadd.f32 %v757_v23, %v741_v35  ;;  %v702_v32 = vmax.f32 %v1377_v8, 0.0 }
 0x14c   : > { %778 = vst [vmem:[%s1417_s25] sm:$0xff] %v762_v26  ;;  %v764_v25 = vadd.f32 %v748_v24, %v732_v17  ;;  %788 = vst [vmem:[%s1417_s25 + $0x50] sm:$0xff] %v772_v21  ;;  %v704_v30 = vmax.f32 %v1381_v12, 0.0  ;;  %v750_v8 = vmax.f32 %v1393_v37, 0.0  ;;  %v752_v60 = vmax.f32 %v1397_v45, 0.0 }
 0x14d   : > { %779 = vst [vmem:[%s1417_s25 + $0x8] sm:$0xff] %v763_v28  ;;  %v765_v36 = vadd.f32 %v749_v27, %v733_v29  ;;  %789 = vst [vmem:[%s1417_s25 + $0x58] sm:$0xff] %v773_v31  ;;  %v629_v38 = vpop.f32.mrb[20].mxu0  ;;  %v689_v34 = vpop.f32.mrb[20].mxu1  ;;  %v753_v63 = vmax.f32 %v1401_v50, 0.0 }
 0x14e   : > { %780 = vst [vmem:[%s1417_s25 + $0x10] sm:$0xff] %v764_v25  ;;  %v718_v40 = vmax.f32 %v629_v38, 0.0  ;;  %v758_v35 = vmax.f32 %v689_v34, 0.0  ;;  %v631_v42 = vpop.f32.mrb[21].mxu0  ;;  %v691_v43 = vpop.f32.mrb[21].mxu1 }
 0x14f   : > { %781 = vst [vmem:[%s1417_s25 + $0x18] sm:$0xff] %v765_v36  ;;  %v719_v10 = vmax.f32 %v631_v42, 0.0  ;;  %v759_v46 = vmax.f32 %v691_v43, 0.0  ;;  %v633_v48 = vpop.f32.mrb[22].mxu0  ;;  %v693_v49 = vpop.f32.mrb[22].mxu1 }
 0x150   : > { %v734_v12 = vadd.f32 %v718_v40, %v702_v32  ;;  %v774_v14 = vadd.f32 %v758_v35, %v1399_v47  ;;  %v720_v51 = vmax.f32 %v633_v48, 0.0  ;;  %v760_v53 = vmax.f32 %v693_v49, 0.0  ;;  %v635_v56 = vpop.f32.mrb[23].mxu0  ;;  %v695_v57 = vpop.f32.mrb[23].mxu1 }
 0x151   : > { %v735_v37 = vadd.f32 %v719_v10, %v703_v33  ;;  %v775_v41 = vadd.f32 %v759_v46, %v1403_v52  ;;  %v721_v58 = vmax.f32 %v635_v56, 0.0  ;;  %v761_v59 = vmax.f32 %v695_v57, 0.0 }
 0x152   : > { %v766_v61 = vadd.f32 %v750_v8, %v734_v12  ;;  %790 = vst [vmem:[%s1417_s25 + $0x60] sm:$0xff] %v774_v14  ;;  %v736_v47 = vadd.f32 %v720_v51, %v704_v30  ;;  %v776_v62 = vadd.f32 %v760_v53, %v1405_v54 }
 0x153   : > { %v767_v1 = vadd.f32 %v751_v44, %v735_v37  ;;  %791 = vst [vmem:[%s1417_s25 + $0x68] sm:$0xff] %v775_v41  ;;  %v737_v52 = vadd.f32 %v721_v58, %v705_v39  ;;  %v777_v3 = vadd.f32 %v761_v59, %v1408_v55 }
 0x154   : > { %782 = vst [vmem:[%s1417_s25 + $0x20] sm:$0xff] %v766_v61  ;;  %v768_v45 = vadd.f32 %v752_v60, %v736_v47  ;;  %792 = vst [vmem:[%s1417_s25 + $0x70] sm:$0xff] %v776_v62 }
 0x155   : > { %783 = vst [vmem:[%s1417_s25 + $0x28] sm:$0xff] %v767_v1  ;;  %v769_v50 = vadd.f32 %v753_v63, %v737_v52  ;;  %793 = vst [vmem:[%s1417_s25 + $0x78] sm:$0xff] %v777_v3 }
 0x156   : > { %784 = vst [vmem:[%s1417_s25 + $0x30] sm:$0xff] %v768_v45 }
 0x157   : > { %785 = vst [vmem:[%s1417_s25 + $0x38] sm:$0xff] %v769_v50 }
 0x158   : > { %1089 = shalt.err (!%p1086_p5)
}
 0x159   : > { %s1090_s8 = scalar_lea.hbm %s1448_s30, 2048  ;;  %s1094_s17 = scalar_lea.hbm %s1502_s2, 4096 }
 0x15a   : > { %p1091_p7 = scmp.ne.s32.totalorder %s1448_s30, %s1090_s8  ;;  %p1095_p12 = scmp.lt.u32.totalorder %s1448_s30, %s1502_s2 }
 0x15b   : > { %p1096_p13 = scmp.lt.u32.totalorder %s1094_s17, %s1090_s8  ;;  %p1098_p1 = scmp.lt.u32.totalorder %s1090_s8, %s1448_s30 }
 0x15c   : > { %p1092_p10 = pnand %p1091_p7, %p1197_p6 }
 0x15d   : > { %p1097_p0 = por %p1096_p13, %p1095_p12 }
 0x15e   : > { %p1093_p11 = pneg %p1092_p10 }
 0x15f   : > { %p1099_p2 = por %p1098_p1, %p1097_p0 }
 0x161   : > { %p1100_p3 = pnand %p1099_p2, %p1093_p11 }
 0x163   : > { %1103 = shalt.err (!%p1100_p3)
}
 0x164   : > { %s1141_s23 = smov 256   ;;  %s1142_s24 = smov 512  }
 0x165   : > { %s1143_s25 = smov 16  }
 0x166   : > { %968 = dma.vmem_to_hbm [thread:$0]  (%p1197_p6), %s1452_s27, 2048, %s1448_s30, %s795_s3, %s1141_s23, %s1142_s24, %s1143_s25  }
 0x167 PF: > { %s823_s26 = sand.u32 1, %s1126_s9   ;;  %p971_p4 = pnand %p878_p9, %p1201_p8 }
 0x168   : > { %s824_s13 = scalar_lea.sflag [#allocation4], %s823_s26 }
 0x169   : > { %1121 = dma.done.wait (!%p971_p4), %s824_s13, 2048  }
 0x16a   : > { %1123 = vsyncadd (!%p971_p4), %s824_s13, 4294965248  ;;  %p12_p5 = scmp.ge.s32.totalorder %s1182_s15, 4   ;;  %s1505_s9 = smov %s1130_s10 }
 0x16b   : > { %s1506_s10 = smov %s1134_s11  ;;  %s1507_s11 = smov %s1195_s18 }
 0x16c   : > { %s1508_s12 = smov %s1182_s15  ;;  %14 = sbr.rel (!%p12_p5) target bundleno = 3 (0x3), region = 106 }
 0x173   :  { %829 = vsyncpa [#allocation4], 1 }
 0x174   :  { %831 = vsyncpa [#allocation4 + $0x1], 1 }

</bundles_post_ra>
